<compile_context>
chip_gen: v5e
topology: v5e:2x2
jax: 0.10.0
libtpu: 0.0.40
codegen_flags: <defaults>
</compile_context>

<pallas_src>
import functools

import jax
import jax.numpy as jnp
from jax.experimental import pallas as pl
from jax.experimental.pallas import tpu as pltpu

_NEG_INF = -1e30  # large finite negative: safe under online-softmax updates


def _pick_tile(n, target, mult):
    """Largest tile <= target that divides n and is a multiple of `mult`.

    Falls back to n (full axis) only when no such divisor exists; keep sequence
    lengths tile-friendly.  TODO(synk): masked remainder tiles for awkward T.
    """
    if n <= target:
        return n
    start = target - (target % mult)
    for t in range(start, mult - 1, -mult):
        if n % t == 0:
            return t
    return n


# --------------------------------------------------------------------------
# Kernel 1: fused per-head QKV projection, written head-major.
# --------------------------------------------------------------------------
def _qkv_proj_kernel(x_ref, w_ref, q_ref, k_ref, v_ref, *, hd):
    # x_ref: (1, tq, d_in)   w_ref: (1, d_in, 3*hd)   q/k/v_ref: (1, 1, tq, hd)
    x = x_ref[0]                                   # native dtype (bf16 stays bf16)
    qkv = jnp.dot(x, w_ref[0], preferred_element_type=jnp.float32)   # (tq, 3*hd)
    q_ref[0, 0] = qkv[:, :hd].astype(q_ref.dtype)
    k_ref[0, 0] = qkv[:, hd:2 * hd].astype(k_ref.dtype)
    v_ref[0, 0] = qkv[:, 2 * hd:].astype(v_ref.dtype)


# --------------------------------------------------------------------------
# Kernel 2: flash attention (online softmax) + fused per-head output projection.
# --------------------------------------------------------------------------
def _flash_attn_kernel(q_ref, k_ref, v_ref, wo_ref, bo_ref, o_ref,
                       m_sc, l_sc, acc_sc, oacc_sc, *, tq, tk):
    # q_ref: (1,1,tq,hd)  k/v_ref: (1,1,tk,hd)  wo_ref: (1,hd,d_out)
    # bo_ref: (1,d_out)   o_ref: (1,tq,d_out)
    # scratch: m/l (tq,1) f32, acc (tq,hd) f32, oacc (tq,d_out) f32
    qi = pl.program_id(1)
    h = pl.program_id(2)
    ki = pl.program_id(3)
    nh = pl.num_programs(2)
    nk = pl.num_programs(3)

    @pl.when(jnp.logical_and(h == 0, ki == 0))
    def _init_out():
        oacc_sc[...] = jnp.zeros_like(oacc_sc)

    @pl.when(ki == 0)
    def _init_head():
        m_sc[...] = jnp.full_like(m_sc, _NEG_INF)
        l_sc[...] = jnp.zeros_like(l_sc)
        acc_sc[...] = jnp.zeros_like(acc_sc)

    q_start = qi * tq
    k_start = ki * tk
    in_range = k_start <= q_start + (tq - 1)           # below / on the diagonal band
    needs_mask = k_start + (tk - 1) > q_start           # tile straddles the diagonal

    def _scores():
        # (tq,hd) x (tk,hd) contracting on hd -> (tq,tk); no explicit K transpose.
        return jax.lax.dot_general(
            q_ref[0, 0], k_ref[0, 0],
            dimension_numbers=(((1,), (1,)), ((), ())),
            preferred_element_type=jnp.float32)

    def _update(s):
        m_prev = m_sc[...]
        m_new = jnp.maximum(m_prev, jnp.max(s, axis=-1, keepdims=True))
        alpha = jnp.exp(m_prev - m_new)
        p = jnp.exp(s - m_new)                                           # (tq,tk) f32
        l_sc[...] = alpha * l_sc[...] + jnp.sum(p, axis=-1, keepdims=True)
        acc_sc[...] = alpha * acc_sc[...] + jnp.dot(
            p.astype(v_ref.dtype), v_ref[0, 0],
            preferred_element_type=jnp.float32)                          # (tq,hd)
        m_sc[...] = m_new

    @pl.when(jnp.logical_and(in_range, jnp.logical_not(needs_mask)))
    def _below_diag():           # fully below the diagonal: no mask needed
        _update(_scores())

    @pl.when(jnp.logical_and(in_range, needs_mask))
    def _on_diag():              # straddles the diagonal: apply causal mask
        s = _scores()
        row = q_start + jax.lax.broadcasted_iota(jnp.int32, (tq, tk), 0)
        col = k_start + jax.lax.broadcasted_iota(jnp.int32, (tq, tk), 1)
        _update(jnp.where(col <= row, s, _NEG_INF))

    @pl.when(ki == nk - 1)
    def _finalize():
        ctx = acc_sc[...] * pl.reciprocal(l_sc[...], approx=True)        # (tq,hd)
        # Fused output projection: concat_heads(ctx) @ Wo == sum_h ctx_h @ Wo_h
        oacc_sc[...] += jnp.dot(ctx.astype(wo_ref.dtype), wo_ref[0],
                                preferred_element_type=jnp.float32)      # (tq,d_out)

        @pl.when(h == nh - 1)
        def _store():
            out = oacc_sc[...] + bo_ref[...].astype(jnp.float32)
            o_ref[0] = out.astype(o_ref.dtype)


# --------------------------------------------------------------------------
# Wrapper
# --------------------------------------------------------------------------
def multi_head_attention(x, wq, wk, wv, wo, bo, *, num_heads,
                         q_tile=128, kv_tile=256):
    """x: (B,T,d_in); wq/wk/wv: (d_in,d_out); wo: (d_out,d_out); bo: (d_out,).

    kv_tile=256 targets the 2x256 MXU on v6e/v7x; use 128 on v5e.
    """
    B, T, d_in = x.shape
    d_out = wq.shape[1]
    assert d_out % num_heads == 0
    hd = d_out // num_heads
    scale = 1.0 / float(hd) ** 0.5

    sub = 16 if x.dtype == jnp.bfloat16 else 8   # dtype-aware sublane multiple
    tq = _pick_tile(T, q_tile, sub)
    tk = _pick_tile(T, kv_tile, sub)

    # Per-head fused QKV weight (H, d_in, 3*hd); 1/sqrt(hd) folded into Wq.
    def _heads(w):
        return w.reshape(d_in, num_heads, hd).transpose(1, 0, 2)        # (H,d_in,hd)
    w_heads = jnp.concatenate(
        [_heads(wq * scale), _heads(wk), _heads(wv)], axis=-1).astype(x.dtype)

    qkv_shape = jax.ShapeDtypeStruct((B, num_heads, T, hd), x.dtype)
    q, k, v = pl.pallas_call(
        functools.partial(_qkv_proj_kernel, hd=hd),
        out_shape=[qkv_shape] * 3,
        grid_spec=pltpu.PrefetchScalarGridSpec(
            num_scalar_prefetch=0,
            grid=(B, T // tq, num_heads),       # h innermost: x tile DMA'd once per (b,t)
            in_specs=[
                pl.BlockSpec((1, tq, d_in), lambda b, t, h: (b, t, 0)),
                pl.BlockSpec((1, d_in, 3 * hd), lambda b, t, h: (h, 0, 0)),
            ],
            out_specs=[pl.BlockSpec((1, 1, tq, hd),
                                    lambda b, t, h: (b, h, t, 0))] * 3,
        ),
        compiler_params=pltpu.CompilerParams(
            dimension_semantics=("parallel", "parallel", "arbitrary"),
            vmem_limit_bytes=64 * 1024 * 1024),
    )(x, w_heads)

    nq = T // tq
    nk = T // tk

    # Clamp K/V block index to the causal range: above-diagonal tiles repeat the
    # previous block index, so their DMA is a no-op (the pl.when guard skips compute).
    def kv_index(b, qi, h, ki):
        ki_max = (qi * tq + tq - 1) // tk
        return (b, h, jnp.minimum(ki, ki_max), 0)

    wo_h = wo.reshape(num_heads, hd, d_out)     # per-head rows of Wo
    bo2 = bo.reshape(1, d_out)

    out = pl.pallas_call(
        functools.partial(_flash_attn_kernel, tq=tq, tk=tk),
        out_shape=jax.ShapeDtypeStruct((B, T, d_out), x.dtype),
        grid_spec=pltpu.PrefetchScalarGridSpec(
            num_scalar_prefetch=0,
            grid=(B, nq, num_heads, nk),
            in_specs=[
                pl.BlockSpec((1, 1, tq, hd), lambda b, qi, h, ki: (b, h, qi, 0)),
                pl.BlockSpec((1, 1, tk, hd), kv_index),
                pl.BlockSpec((1, 1, tk, hd), kv_index),
                pl.BlockSpec((1, hd, d_out), lambda b, qi, h, ki: (h, 0, 0)),
                pl.BlockSpec((1, d_out), lambda b, qi, h, ki: (0, 0)),
            ],
            out_specs=pl.BlockSpec((1, tq, d_out), lambda b, qi, h, ki: (b, qi, 0)),
            scratch_shapes=[
                pltpu.VMEM((tq, 1), jnp.float32),       # m (running max)
                pltpu.VMEM((tq, 1), jnp.float32),       # l (running denom)
                pltpu.VMEM((tq, hd), jnp.float32),      # per-head acc
                pltpu.VMEM((tq, d_out), jnp.float32),   # output accumulator over heads
            ],
        ),
        compiler_params=pltpu.CompilerParams(
            dimension_semantics=("parallel", "parallel", "arbitrary", "arbitrary"),
            vmem_limit_bytes=64 * 1024 * 1024),
    )(q, k, v, wo_h, bo2)
    return out


# --------------------------------------------------------------------------
# Pure-JAX reference (matches the PyTorch module: dropout=0, qkv_bias=False)
# --------------------------------------------------------------------------
def _reference(x, wq, wk, wv, wo, bo, *, num_heads):
    B, T, d_in = x.shape
    d_out = wq.shape[1]
    hd = d_out // num_heads
    q = (x @ wq).reshape(B, T, num_heads, hd).transpose(0, 2, 1, 3)
    k = (x @ wk).reshape(B, T, num_heads, hd).transpose(0, 2, 1, 3)
    v = (x @ wv).reshape(B, T, num_heads, hd).transpose(0, 2, 1, 3)
    scores = jnp.einsum("bhqd,bhkd->bhqk", q, k) / hd ** 0.5
    mask = jnp.triu(jnp.ones((T, T), dtype=bool), k=1)
    scores = jnp.where(mask[None, None], -jnp.inf, scores)
    attn = jax.nn.softmax(scores, axis=-1)
    ctx = jnp.einsum("bhqk,bhkd->bhqd", attn, v).transpose(0, 2, 1, 3).reshape(B, T, d_out)
    return ctx @ wo + bo


if __name__ == "__main__":
    key = jax.random.PRNGKey(0)
    B, T, d_in, d_out, num_heads = 2, 8, 16, 32, 4

    k_x, k_q, k_k, k_v, k_o, k_b = jax.random.split(key, 6)
    x = jax.random.normal(k_x, (B, T, d_in), dtype=jnp.float32)
    # weights stored as (in, out) == transpose of nn.Linear.weight
    wq = jax.random.normal(k_q, (d_in, d_out), dtype=jnp.float32) * 0.1
    wk = jax.random.normal(k_k, (d_in, d_out), dtype=jnp.float32) * 0.1
    wv = jax.random.normal(k_v, (d_in, d_out), dtype=jnp.float32) * 0.1
    wo = jax.random.normal(k_o, (d_out, d_out), dtype=jnp.float32) * 0.1
    bo = jax.random.normal(k_b, (d_out,), dtype=jnp.float32) * 0.1

    out = multi_head_attention(x, wq, wk, wv, wo, bo, num_heads=num_heads)
    out = jax.block_until_ready(out)

    ref = _reference(x, wq, wk, wv, wo, bo, num_heads=num_heads)
    assert out.shape == (B, T, d_out)
    # tolerance allows for the EUP approximate reciprocal in the softmax denom
    assert jnp.allclose(out, ref, atol=2e-3, rtol=2e-3), "mismatch vs reference"

    print("KERNEL_OK")
</pallas_src>

<mosaic_0001>
module attributes {stable_mosaic.version = 11 : i64} {
  func.func @_qkv_proj_kernel(%arg0: i32, %arg1: i32, %arg2: i32, %arg3: memref<1x8x16xf32, #tpu.memory_space<vmem>>, %arg4: memref<1x16x24xf32, #tpu.memory_space<vmem>>, %arg5: memref<1x1x8x8xf32, #tpu.memory_space<vmem>>, %arg6: memref<1x1x8x8xf32, #tpu.memory_space<vmem>>, %arg7: memref<1x1x8x8xf32, #tpu.memory_space<vmem>>) attributes {dimension_semantics = [#tpu.dimension_semantics<parallel>, #tpu.dimension_semantics<parallel>, #tpu.dimension_semantics<arbitrary>], iteration_bounds = array<i64: 2, 1, 4>, scalar_prefetch = 0 : i64, scratch_operands = 0 : i64, tpu.core_type = #tpu.core_type<tc>, window_params = [{transform_indices = @transform_0, window_bounds = array<i64: 1, 8, 16>}, {transform_indices = @transform_1, window_bounds = array<i64: 1, 16, 24>}, {transform_indices = @transform_2, window_bounds = array<i64: 1, 1, 8, 8>}, {transform_indices = @transform_3, window_bounds = array<i64: 1, 1, 8, 8>}, {transform_indices = @transform_4, window_bounds = array<i64: 1, 1, 8, 8>}]} {
    %c0 = arith.constant 0 : index
    %c0_0 = arith.constant 0 : index
    %c0_1 = arith.constant 0 : index
    %0 = vector.load %arg3[%c0, %c0_0, %c0_1] : memref<1x8x16xf32, #tpu.memory_space<vmem>>, vector<1x8x16xf32>
    %1 = vector.shape_cast %0 : vector<1x8x16xf32> to vector<8x16xf32>
    %c0_2 = arith.constant 0 : index
    %c0_3 = arith.constant 0 : index
    %c0_4 = arith.constant 0 : index
    %2 = vector.load %arg4[%c0_2, %c0_3, %c0_4] : memref<1x16x24xf32, #tpu.memory_space<vmem>>, vector<1x16x24xf32>
    %3 = vector.shape_cast %2 : vector<1x16x24xf32> to vector<16x24xf32>
    %cst = arith.constant dense<0.000000e+00> : vector<8x24xf32>
    %4 = tpu.matmul %1, %3, %cst {dimension_numbers = #tpu.dot_dimension_numbers<[1], [0], [0], [1], [0, 0, 1, 1], [], []>} : vector<8x16xf32>, vector<16x24xf32>, vector<8x24xf32> -> vector<8x24xf32>
    %5 = vector.extract_strided_slice %4 {offsets = [0, 0], sizes = [8, 8], strides = [1, 1]} : vector<8x24xf32> to vector<8x8xf32>
    %c0_5 = arith.constant 0 : index
    %c0_6 = arith.constant 0 : index
    %c0_7 = arith.constant 0 : index
    %c0_8 = arith.constant 0 : index
    %6 = vector.load %arg5[%c0_5, %c0_6, %c0_7, %c0_8] : memref<1x1x8x8xf32, #tpu.memory_space<vmem>>, vector<1x1x8x8xf32>
    %7 = vector.shape_cast %6 : vector<1x1x8x8xf32> to vector<8x8xf32>
    %8 = vector.shape_cast %5 : vector<8x8xf32> to vector<1x1x8x8xf32>
    tpu.vector_store %arg5[%c0_5, %c0_6, %c0_7, %c0_8], %8 {strides = array<i32>} : memref<1x1x8x8xf32, #tpu.memory_space<vmem>>, vector<1x1x8x8xf32>,
    %9 = vector.extract_strided_slice %4 {offsets = [0, 8], sizes = [8, 8], strides = [1, 1]} : vector<8x24xf32> to vector<8x8xf32>
    %c0_9 = arith.constant 0 : index
    %c0_10 = arith.constant 0 : index
    %c0_11 = arith.constant 0 : index
    %c0_12 = arith.constant 0 : index
    %10 = vector.load %arg6[%c0_9, %c0_10, %c0_11, %c0_12] : memref<1x1x8x8xf32, #tpu.memory_space<vmem>>, vector<1x1x8x8xf32>
    %11 = vector.shape_cast %10 : vector<1x1x8x8xf32> to vector<8x8xf32>
    %12 = vector.shape_cast %9 : vector<8x8xf32> to vector<1x1x8x8xf32>
    tpu.vector_store %arg6[%c0_9, %c0_10, %c0_11, %c0_12], %12 {strides = array<i32>} : memref<1x1x8x8xf32, #tpu.memory_space<vmem>>, vector<1x1x8x8xf32>,
    %13 = vector.extract_strided_slice %4 {offsets = [0, 16], sizes = [8, 8], strides = [1, 1]} : vector<8x24xf32> to vector<8x8xf32>
    %c0_13 = arith.constant 0 : index
    %c0_14 = arith.constant 0 : index
    %c0_15 = arith.constant 0 : index
    %c0_16 = arith.constant 0 : index
    %14 = vector.load %arg7[%c0_13, %c0_14, %c0_15, %c0_16] : memref<1x1x8x8xf32, #tpu.memory_space<vmem>>, vector<1x1x8x8xf32>
    %15 = vector.shape_cast %14 : vector<1x1x8x8xf32> to vector<8x8xf32>
    %16 = vector.shape_cast %13 : vector<8x8xf32> to vector<1x1x8x8xf32>
    tpu.vector_store %arg7[%c0_13, %c0_14, %c0_15, %c0_16], %16 {strides = array<i32>} : memref<1x1x8x8xf32, #tpu.memory_space<vmem>>, vector<1x1x8x8xf32>,
    return
  }
  func.func @transform_0(%arg0: i32, %arg1: i32, %arg2: i32) -> (i32, i32, i32) {
    %c0_i32 = arith.constant 0 : i32
    %c0_i32_0 = arith.constant 0 : i32
    return %arg0, %arg1, %c0_i32 : i32, i32, i32
  }
  func.func @transform_1(%arg0: i32, %arg1: i32, %arg2: i32) -> (i32, i32, i32) {
    %c0_i32 = arith.constant 0 : i32
    %c0_i32_0 = arith.constant 0 : i32
    %c0_i32_1 = arith.constant 0 : i32
    return %arg2, %c0_i32, %c0_i32_0 : i32, i32, i32
  }
  func.func @transform_2(%arg0: i32, %arg1: i32, %arg2: i32) -> (i32, i32, i32, i32) {
    %c0_i32 = arith.constant 0 : i32
    %c0_i32_0 = arith.constant 0 : i32
    return %arg0, %arg2, %arg1, %c0_i32 : i32, i32, i32, i32
  }
  func.func @transform_3(%arg0: i32, %arg1: i32, %arg2: i32) -> (i32, i32, i32, i32) {
    %c0_i32 = arith.constant 0 : i32
    %c0_i32_0 = arith.constant 0 : i32
    return %arg0, %arg2, %arg1, %c0_i32 : i32, i32, i32, i32
  }
  func.func @transform_4(%arg0: i32, %arg1: i32, %arg2: i32) -> (i32, i32, i32, i32) {
    %c0_i32 = arith.constant 0 : i32
    %c0_i32_0 = arith.constant 0 : i32
    return %arg0, %arg2, %arg1, %c0_i32 : i32, i32, i32, i32
  }
}

</mosaic_0001>

<bundles_post_ra>
// kernel: tpu_custom_call.1
= control target key start
LH: loop header
LB: loop body
LE: loop exit
PB: predicated region body
PF: predicated region fallthrough
CT: control target
= control target key end

     0   :  { %s1353_s0 = inlined_call_operand.hbm [shape: f32[2,8,16], index: 0, kind: input, shape index: {}]   ;;  %s1354_s1 = inlined_call_operand.hbm [shape: f32[4,16,24], index: 1, kind: input, shape index: {}]   ;;  %s1355_s2 = inlined_call_operand.hbm [shape: f32[2,4,8,8], index: 2, kind: output, shape index: {0}]   ;;  %s1356_s3 = inlined_call_operand.hbm [shape: f32[2,4,8,8], index: 3, kind: output, shape index: {1}]   ;;  %s1357_s4 = inlined_call_operand.hbm [shape: f32[2,4,8,8], index: 4, kind: output, shape index: {2}]  }
   0x1   :  { %1372 = sst [smem:[#allocation24_spill]] %s1353_s0 }
   0x2   :  { %1373 = sst [smem:[#allocation25_spill]] %s1354_s1 }
   0x3   :  { %1374 = sst [smem:[#allocation26_spill]] %s1355_s2 }
   0x4   :  { %1375 = sst [smem:[#allocation27_spill]] %s1356_s3 }
   0x5   :  { %1376 = sst [smem:[#allocation28_spill]] %s1357_s4 }
   0x6   :  { %10 = vsyncpa [#allocation3], 0 }
   0x7   :  { %12 = vsyncpa [#allocation3 + $0x1], 0 }
   0x8   :  { %13 = vsyncpa [#allocation6], 0 }
   0x9   :  { %15 = vsyncpa [#allocation6 + $0x1], 0 }
   0xa   :  { %16 = vsyncpa [#allocation4], 0 }
   0xb   :  { %18 = vsyncpa [#allocation4 + $0x1], 0 }
   0xc   :  { %19 = vsyncpa [#allocation9], 0 }
   0xd   :  { %21 = vsyncpa [#allocation9 + $0x1], 0  ;;  %s1064_s15 = smov 0   ;;  %s1066_s16 = smov 0  }
   0xe   :  { %s1068_s17 = smov 0   ;;  %s1070_s18 = smov 0  }
   0xf   :  { %s1072_s19 = smov 0   ;;  %s1074_s20 = smov 0  }
  0x10   :  { %s1076_s21 = smov 0   ;;  %s1078_s22 = smov 0  }
  0x11   :  { %s1080_s23 = smov 0   ;;  %s1082_s24 = smov 0  }
  0x12   :  { %s1084_s25 = smov 0   ;;  %s1086_s26 = smov 0  }
  0x13   :  { %s1088_s27 = smov 0   ;;  %s1090_s28 = smov 0  }
  0x14 LB: > { %1377 = sst [smem:[#allocation15_spill]] %s981_s15  ;;  %s1131_s29 = sadd.s32 4294967295, %s1033_s28   ;;  %s1033_s28 = sphi %s1090_s28, %s27_s28   ;;  %s1029_s27 = sphi %s1088_s27, %s1424_s27   ;;  %s1025_s26 = sphi %s1086_s26, %s1412_s26   ;;  %s1021_s25 = sphi %s1084_s25, %s1423_s25   ;;  %s1017_s24 = sphi %s1082_s24, %s1411_s24   ;;  %s1013_s23 = sphi %s1080_s23, %s1422_s23   ;;  %s1009_s22 = sphi %s1078_s22, %s1421_s22   ;;  %s1005_s21 = sphi %s1076_s21, %s1420_s21   ;;  %s1001_s20 = sphi %s1074_s20, %s1419_s20   ;;  %s997_s19 = sphi %s1072_s19, %s1418_s19   ;;  %s993_s18 = sphi %s1070_s18, %s1417_s18   ;;  %s989_s17 = sphi %s1068_s17, %s1416_s17   ;;  %s985_s16 = sphi %s1066_s16, %s1415_s16   ;;  %s981_s15 = sphi %s1064_s15, %s1414_s15  }
  0x15   : > { %1378 = sst [smem:[#allocation16_spill]] %s1017_s24  ;;  %s1358_s30 = sadd.s32 4294967294, %s1033_s28  }
  0x16   : > { %1379 = sst [smem:[#allocation17_spill]] %s1021_s25  ;;  %p62_p0 = scmp.ne.s32.totalorder %s1013_s23, %s1009_s22 }
  0x17   : > { %1380 = sst [smem:[#allocation18_spill]] %s1025_s26  ;;  %p63_p1 = scmp.eq.s32.totalorder %s1033_s28, 0 }
  0x18   : > { %1381 = sst [smem:[#allocation19_spill]] %s1033_s28  ;;  %p68_p2 = scmp.ne.s32.totalorder %s1009_s22, %s1005_s21 }
  0x19   : > { %1382 = sst [smem:[#allocation20_spill]] %s1131_s29  ;;  %p69_p3 = scmp.eq.s32.totalorder %s1131_s29, 0 }
  0x1a   : > { %p1141_p4 = por %p63_p1, %p62_p0  ;;  %p88_p5 = scmp.ne.s32.totalorder %s1001_s20, %s997_s19 }
  0x1b   : > { %p1147_p6 = por %p69_p3, %p68_p2  ;;  %p94_p7 = scmp.ne.s32.totalorder %s997_s19, %s993_s18 }
  0x1c   : > { %p1152_p8 = por %p88_p5, %p63_p1  ;;  %p121_p9 = scmp.ne.s32.totalorder %s989_s17, %s985_s16 }
  0x1d   : > { %p1158_p10 = por %p94_p7, %p69_p3  ;;  %p122_p11 = scmp.eq.s32.totalorder %s1131_s29, 7 }
  0x1e   : > { %p127_p12 = scmp.ne.s32.totalorder %s985_s16, %s981_s15  ;;  %p128_p13 = scmp.eq.s32.totalorder %s1358_s30, 7 }
  0x1f   : > { %p1167_p0 = por %p122_p11, %p121_p9  ;;  %p645_p2 = scmp.lt.s32.totalorder %s1033_s28, 8 }
  0x20   : > { %p1171_p1 = por %p128_p13, %p127_p12  ;;  %s208_s13 = sand.u32 1, %s1013_s23  }
  0x21   : > { %s1387_s11 = scalar_select %p1167_p0, 1, 0 }
  0x22   : > { %s1389_s12 = scalar_select %p1171_p1, 1, 0 }
  0x23   : > { %1388 = sst [smem:[#allocation21_spill]] %s1387_s11  ;;  %s595_s14 = sshll.u32 %s1029_s27, 3 }
  0x24   : > { %1390 = sst [smem:[#allocation22_spill]] %s1389_s12  ;;  %s594_s18 = sshll.u32 %s208_s13, 3 }
  0x25   : > { %s1391_s0 = sld [smem:[#allocation24_spill]]  ;;  %s212_s15 = scalar_lea.vmem [#allocation2], %s594_s18 }
  0x26   : > { %s221_s4 = sshll.u32 %s212_s15, 4  ;;  %p629_p3 = pnand %p645_p2, %p1141_p4  ;;  %s222_s4 = int_to_ptr.vmem [resolvable:$true] %s221_s4 }
  0x27   : > { %p1185_p5 = pnand %p645_p2, %p1152_p8  ;;  %p599_p7 = scmp.ge.s32.totalorder %s1033_s28, 1 }
  0x28   : > { %p248_p9 = scmp.lt.s32.totalorder %s1033_s28, 9  ;;  %s209_s6 = scalar_lea.sflag [#allocation3], %s208_s13 }
  0x29   : > { %s81_s15 = sadd.s32 1, %s1001_s20  ;;  %s39_s7 = sadd.s32 1, %s1025_s26 }
  0x2a   : > { %p1191_p11 = pnand %p599_p7, %p248_p9  ;;  %p40_p4 = scmp.ge.s32.totalorder %s39_s7, 4 }
  0x2b   : > { %s217_s30 = scalar_lea.hbm %s1391_s0, %s595_s14  ;;  %s111_s14 = sadd.s32 1, %s989_s17 }
  0x2c   : > { %s219_s5 = sshll.u32 %s217_s30, 4  ;;  %s228_s9 = sand.u32 1, %s1001_s20   ;;  %s220_s5 = int_to_ptr.hbm [resolvable:$true] %s219_s5 }
  0x2d   : > { %631 = dma.hbm_to_vmem [thread:$0]  (!%p629_p3), %s220_s5, 128, %s222_s4, %s209_s6  }
  0x2e   : > { %s596_s18 = sshll.u32 %s228_s9, 4  ;;  %s1426_s7 = smov (%p40_p4, %s39_s7), 0 }
  0x2f   : > { %1394 = sst [smem:[#allocation23_spill]] %s1426_s7  ;;  %s1395_s21 = sadd.s32 1, %s1029_s27 }
  0x30   : > { %s1428_s21 = smov (!%p40_p4, %s1395_s21), %s1029_s27  ;;  %s78_s4 = ssub.s32 %s1025_s26, %s1426_s7 }
  0x31   : > { %p48_p8 = scmp.ge.s32.totalorder %s1428_s21, 2  ;;  %p79_p12 = scmp.eq.s32.totalorder %s78_s4, 0 }
  0x32   : > { %s617_s5 = sshll.u32 %s1025_s26, 4  ;;  %s232_s13 = scalar_lea.vmem [#allocation5], %s596_s18 }
  0x33   : > { %s240_s6 = sshll.u32 %s232_s13, 4  ;;  %s1430_s21 = smov (%p48_p8, %s1428_s21), 0  ;;  %s241_s6 = int_to_ptr.vmem [resolvable:$true] %s240_s6 }
  0x34   : > { %s1210_s0 = scalar_select %p79_p12, %s1001_s20, %s81_s15  }
  0x35   : > { %s50_s28 = ssub.s32 %s1029_s27, %s1430_s21  ;;  %s1396_s1 = sld [smem:[#allocation25_spill]] }
  0x36   : > { %p53_p13 = scmp.eq.s32.totalorder %s50_s28, 0  ;;  %s106_s2 = sor.u32 %s78_s4, %s50_s28 }
  0x37   : > { %p109_p2 = scmp.eq.s32.totalorder %s106_s2, 0  ;;  %s1397_s24 = sadd.s32 1, %s1013_s23 }
  0x38   : > { %s1220_s25 = scalar_select %p53_p13, %s1013_s23, %s1397_s24  }
  0x39   : > { %s1223_s18 = scalar_select %p109_p2, %s989_s17, %s111_s14  }
  0x3a   : > { %s229_s13 = scalar_lea.sflag [#allocation6], %s228_s9  ;;  %s1035_s26 = smov 128  }
  0x3b   : > { %s237_s11 = scalar_lea.hbm %s1396_s1, %s617_s5  ;;  %s1036_s15 = smov 8  }
  0x3c   : > { %s238_s7 = sshll.u32 %s237_s11, 4  ;;  %252 = sbr.rel (%p1191_p11) target bundleno = 331 (0x14b), region = 28  ;;  %s239_s7 = int_to_ptr.hbm [resolvable:$true] %s238_s7 }
  0x3d   : > { %634 = dma.hbm_to_vmem [thread:$0]  (!%p1185_p5), %s239_s7, 256, %s241_s6, %s229_s13, %s1035_s26, %s1035_s26, %s1036_s15  }
  0x3e   : > { %s254_s3 = sand.u32 (!%p1191_p11), 1, %s1009_s22  }
  0x3f   : > { %s600_s2 = sshll.u32 (!%p1191_p11), %s254_s3, 3  ;;  %s255_s28 = scalar_lea.sflag (!%p1191_p11), [#allocation3], %s254_s3 }
  0x40   : > { %s258_s29 = scalar_lea.vmem (!%p1191_p11), [#allocation2], %s600_s2 }
  0x41   : > { %964 = dma.done.wait (%p1147_p6), %s255_s28, 128  }
  0x42   : > { %966 = vsyncadd (%p1147_p6), %s255_s28, 4294967168  ;;  %s264_s24 = sand.u32 1, %s997_s19  }
  0x43   : > { %s601_s11 = sshll.u32 %s264_s24, 4  ;;  %s265_s12 = scalar_lea.sflag [#allocation6], %s264_s24 }
  0x44   : > { %s268_s26 = scalar_lea.vmem [#allocation5], %s601_s11 }
  0x45   : > { %968 = dma.done.wait (%p1158_p10), %s265_s12, 256  }
  0x46   : > { %970 = vsyncadd (%p1158_p10), %s265_s12, 4294967040  ;;  %s1398_s30 = sld [smem:[#allocation17_spill]]  ;;  %v311_v0 = vld [vmem:[%s268_s26 + $0x8] sm:$0xff]  ;;  %v310_v1 = vld [vmem:[%s268_s26] sm:$0xff]  ;;  %vm312_vm0 = vcmask 130048   ;;  %s292_s8 = sand.u32 1, %s985_s16  }
  0x47   : > { %s1399_s7 = sld [smem:[#allocation16_spill]]  ;;  %330 = vmatpush.msra.mxu0 %v311_v0  ;;  %v309_v2 = vld [vmem:[%s258_s29] sm:$0xff]  ;;  %s1242_s4 = sshll.u32 %s292_s8, 3  ;;  %vm336_vm1 = vcmask 64512  }
  0x48   : > { %s1400_s13 = sld [smem:[#allocation26_spill]]  ;;  %s294_s2 = scalar_lea.vmem [#allocation7], %s1242_s4 }
  0x49   : > { %331 = vmatpush.msra.mxu0 %v310_v1  ;;  %s373_s28 = sshll.u32 %s294_s2, 4  ;;  %s1037_s24 = smov 120   ;;  %s374_s28 = int_to_ptr.vmem [resolvable:$true] %s373_s28 }
  0x4a   : > { %605 = vmatmul.msk.f32.vlgmr.msra.gmra.mxu0 %vm312_vm0, %v309_v2  ;;  %s348_s11 = scalar_lea.sflag [#allocation4], %s292_s8 }
  0x4c   : > { %s609_s14 = sshll.u32 %s1398_s30, 2 }
  0x4d   : > { %s369_s9 = sadd.s32 %s1399_s7, %s609_s14 }
  0x4e   : > { %s1244_s5 = sshll.u32 %s369_s9, 3  ;;  %s843_s14 = scalar_lea.hbm %s1400_s13, 64 }
  0x4f   : > { %s371_s15 = scalar_lea.hbm %s1400_s13, %s1244_s5 }
  0x50   : > { %s375_s29 = sshll.u32 %s371_s15, 4  ;;  %s376_s29 = int_to_ptr.hbm [resolvable:$true] %s375_s29 }
  0x51   : > { %s837_s12 = sshra.s32 %s376_s29, 4  ;;  %s838_s12 = int_to_ptr.hbm [resolvable:$true] %s837_s12 }
  0x52   : > { %s839_s26 = scalar_lea.hbm %s838_s12, 8  ;;  %p844_p5 = scmp.lt.s32.totalorder %s838_s12, %s1400_s13 }
  0x53   : > { %p840_p6 = scmp.ne.s32.totalorder %s838_s12, %s839_s26  ;;  %p845_p7 = scmp.lt.s32.totalorder %s843_s14, %s839_s26 }
  0x55   : > { %p841_p10 = pnand %p840_p6, %p1167_p0  ;;  %p846_p9 = por %p845_p7, %p844_p5 }
  0x57   : > { %p842_p3 = pneg %p841_p10 }
  0x59   : > { %p847_p11 = pnand %p846_p9, %p842_p3 }
  0xc7   : > { %v333_v3 = vpop.f32.mrf.mxu0 }
  0xc8   : > { %337 = vst.msk [vmem:[%s294_s2] sm:$0xff] %vm336_vm1, %v333_v3  ;;  %339 = vrot.lane.b32.xlu0 %v333_v3, %s1037_s24 }
  0xc9   : > { %850 = shalt.err (!%p847_p11)
}
  0xca   : > { %s1402_s8 = sld [smem:[#allocation20_spill]]  ;;  %s1038_s6 = smov 112  }
  0xcb   : > { %622 = dma.vmem_to_hbm [thread:$0]  (%p1167_p0), %s374_s28, 128, %s376_s29, %s348_s11  }
  0xcc   : > { %s1403_s24 = sld [smem:[#allocation27_spill]]  ;;  %s301_s12 = scalar_lea.vmem [#allocation8], %s1242_s4 }
  0xcd   : > { %s390_s26 = sshll.u32 %s301_s12, 4  ;;  %s1405_s13 = sld [smem:[#allocation28_spill]]  ;;  %s391_s26 = int_to_ptr.vmem [resolvable:$true] %s390_s26 }
  0xd0   : > { %343 = vrot.lane.b32.xlu0 %v333_v3, %s1038_s6  ;;  %s352_s9 = sand.u32 1, %s1402_s8  }
  0xd1   : > { %s1273_s29 = scalar_lea.sflag [#allocation9], %s352_s9 }
  0xd2   : > { %s1404_s30 = smov %s1403_s24  ;;  %s388_s7 = scalar_lea.hbm %s1403_s24, %s1244_s5 }
  0xd3   : > { %s392_s14 = sshll.u32 %s388_s7, 4  ;;  %s405_s28 = scalar_lea.hbm %s1405_s13, %s1244_s5  ;;  %s393_s14 = int_to_ptr.hbm [resolvable:$true] %s392_s14 }
  0xd4   : > { %s865_s11 = sshra.s32 %s393_s14, 4  ;;  %s871_s2 = scalar_lea.hbm %s1404_s30, 64  ;;  %s866_s11 = int_to_ptr.hbm [resolvable:$true] %s865_s11 }
  0xd5   : > { %s867_s6 = scalar_lea.hbm %s866_s11, 8  ;;  %p872_p13 = scmp.lt.s32.totalorder %s866_s11, %s1404_s30 }
  0xd6   : > { %p868_p4 = scmp.ne.s32.totalorder %s866_s11, %s867_s6  ;;  %p873_p2 = scmp.lt.s32.totalorder %s871_s2, %s867_s6 }
  0xd8   : > { %p869_p8 = pnand %p868_p4, %p1167_p0  ;;  %p874_p6 = por %p873_p2, %p872_p13 }
  0xda   : > { %p870_p12 = pneg %p869_p8 }
  0xdc   : > { %p875_p10 = pnand %p874_p6, %p870_p12 }
 0x13a   : > { %v340_v4 = vpop.permute.xlu0 %339 }
 0x13b   : > { %342 = vst.msk [vmem:[%s301_s12] sm:$0xff] %vm336_vm1, %v340_v4 }
 0x13c   : > { %878 = shalt.err (!%p875_p10)
}
 0x13d   : > { %623 = dma.vmem_to_hbm [thread:$0]  (%p1167_p0), %s391_s26, 128, %s393_s14, %s1273_s29  }
 0x13e   : > { %s308_s1 = scalar_lea.vmem [#allocation10], %s1242_s4  ;;  %s409_s9 = sshll.u32 %s405_s28, 4  ;;  %s410_s9 = int_to_ptr.hbm [resolvable:$true] %s409_s9 }
 0x13f   : > { %s407_s5 = sshll.u32 %s308_s1, 4  ;;  %s893_s12 = sshra.s32 %s410_s9, 4  ;;  %s408_s5 = int_to_ptr.vmem [resolvable:$true] %s407_s5  ;;  %s894_s12 = int_to_ptr.hbm [resolvable:$true] %s893_s12 }
 0x140   : > { %s895_s10 = scalar_lea.hbm %s894_s12, 8  ;;  %s899_s8 = scalar_lea.hbm %s1405_s13, 64 }
 0x141   : > { %p896_p3 = scmp.ne.s32.totalorder %s894_s12, %s895_s10  ;;  %p900_p9 = scmp.lt.s32.totalorder %s894_s12, %s1405_s13 }
 0x142   : > { %v344_v5 = vpop.permute.xlu0 %343  ;;  %p901_p11 = scmp.lt.s32.totalorder %s899_s8, %s895_s10 }
 0x143   : > { %346 = vst.msk [vmem:[%s308_s1] sm:$0xff] %vm336_vm1, %v344_v5  ;;  %p897_p5 = pnand %p896_p3, %p1167_p0 }
 0x144   : > { %p902_p4 = por %p901_p11, %p900_p9 }
 0x145   : > { %p898_p7 = pneg %p897_p5 }
 0x147   : > { %p903_p8 = pnand %p902_p4, %p898_p7 }
 0x149   : > { %906 = shalt.err (!%p903_p8)
}
 0x14a   : > { %624 = dma.vmem_to_hbm [thread:$0]  (%p1167_p0), %s408_s5, 128, %s410_s9, %s1273_s29  }
 0x14b PF: > { %s1406_s14 = sld [smem:[#allocation19_spill]] }
 0x14c   : > { %s1407_s28 = sld [smem:[#allocation15_spill]] }
 0x151   : > { %p646_p12 = scmp.ge.s32.totalorder %s1406_s14, 2 }
 0x152   : > { %s421_s2 = sand.u32 1, %s1407_s28  }
 0x153   : > { %p636_p13 = pnand %p646_p12, %p1171_p1  ;;  %s422_s24 = scalar_lea.sflag [#allocation4], %s421_s2 }
 0x155   : > { %p637_p2 = pneg %p636_p13 }
 0x157   : > { %972 = dma.done.wait (%p637_p2), %s422_s24, 128  }
 0x158   : > { %974 = vsyncadd (%p637_p2), %s422_s24, 4294967168  ;;  %s1409_s7 = sadd.s32 4294967294, %s1406_s14  }
 0x159   : > { %s431_s1 = sand.u32 1, %s1409_s7  }
 0x15a   : > { %s432_s12 = scalar_lea.sflag [#allocation9], %s431_s1 }
 0x15b   : > { %976 = dma.done.wait (%p637_p2), %s432_s12, 256  }
 0x15c   : > { %978 = vsyncadd (%p637_p2), %s432_s12, 4294967040  ;;  %s27_s28 = sadd.s32 1, %s1406_s14   ;;  %s1411_s24 = sld [smem:[#allocation18_spill]] }
 0x15d   : > { %p1306_p0 = scmp.ge.s32.totalorder %s27_s28, 10   ;;  %s1412_s26 = sld [smem:[#allocation23_spill]] }
 0x15e   : > { %s1413_s29 = smov %s1430_s21  ;;  %s1414_s15 = smov %s985_s16 }
 0x15f   : > { %s1415_s16 = smov %s989_s17  ;;  %s1416_s17 = smov %s1223_s18 }
 0x160   : > { %s1417_s18 = smov %s997_s19  ;;  %s1418_s19 = smov %s1001_s20 }
 0x161   : > { %s1419_s20 = smov %s1210_s0  ;;  %s1420_s21 = smov %s1009_s22 }
 0x162   : > { %s1421_s22 = smov %s1013_s23  ;;  %s1422_s23 = smov %s1220_s25 }
 0x163   : > { %s1423_s25 = smov %s1029_s27  ;;  %s1424_s27 = smov %s1413_s29 }
 0x164   :  { %26 = sbr.rel (!%p1306_p0) target bundleno = 20 (0x14), region = 118 }
 0x169   :  { %448 = vsyncpa [#allocation3], 1 }
 0x16a   :  { %450 = vsyncpa [#allocation3 + $0x1], 1 }
 0x16b   :  { %451 = vsyncpa [#allocation6], 1 }
 0x16c   :  { %453 = vsyncpa [#allocation6 + $0x1], 1 }
 0x16d   :  { %454 = vsyncpa [#allocation4], 1 }
 0x16e   :  { %456 = vsyncpa [#allocation4 + $0x1], 1 }
 0x16f   :  { %457 = vsyncpa [#allocation9], 1 }
 0x170   :  { %459 = vsyncpa [#allocation9 + $0x1], 1 }

</bundles_post_ra>
